<compile_context>
chip_gen: v5e
topology: v5e:2x2
jax: 0.10.0
libtpu: 0.0.40
codegen_flags: <defaults>
</compile_context>

<pallas_src>
import math
import functools

import jax
import jax.numpy as jnp
from jax.experimental import pallas as pl
from jax.experimental.pallas import tpu as pltpu


# ----------------------------------------------------------------------------
# Pallas kernel: whole per-batch-row DiT block forward
# ----------------------------------------------------------------------------
def _dit_block_kernel(
    x_ref, mod_ref,
    ln1w_ref, ln1b_ref, ln2w_ref, ln2b_ref,
    wq_ref, bq_ref, wk_ref, bk_ref, wv_ref, bv_ref,
    wlv_ref, blv_ref,
    wf1_ref, bf1_ref, wf2_ref, bf2_ref,
    out_ref,
    *, head_num: int, head_dim: int, seq_len: int,
):
    H, L, Dh = head_num, seq_len, head_dim

    x = x_ref[0]                     # (L, E) f32
    mod = mod_ref[0]                 # (6, E) f32: gamma1, beta1, alpha1, gamma2, beta2, alpha2
    g1, be1, a1 = mod[0:1, :], mod[1:2, :], mod[2:3, :]
    g2, be2, a2 = mod[3:4, :], mod[4:5, :], mod[5:6, :]

    def layer_norm(z, w, b):
        mu = jnp.mean(z, axis=-1, keepdims=True)
        var = jnp.mean((z - mu) ** 2, axis=-1, keepdims=True)
        return (z - mu) * jax.lax.rsqrt(var + 1e-5) * w + b

    # --- attention branch -----------------------------------------------------
    y = layer_norm(x, ln1w_ref[...], ln1b_ref[...])
    y = y * (1.0 + g1) + be1                                   # (L, E) f32
    yb = jnp.broadcast_to(y.astype(jnp.bfloat16)[None, :, :], (H, L, y.shape[-1]))

    # Batched-over-heads projections; q/k/v weights are pre-shaped (H, E, Dh).
    q = jnp.einsum("hle,hed->hld", yb, wq_ref[...],
                   preferred_element_type=jnp.float32) + bq_ref[...]   # (H, L, Dh)
    k = jnp.einsum("hle,hed->hld", yb, wk_ref[...],
                   preferred_element_type=jnp.float32) + bk_ref[...]
    v = jnp.einsum("hle,hed->hld", yb, wv_ref[...],
                   preferred_element_type=jnp.float32) + bv_ref[...]

    # NOTE: PyTorch reference scales by sqrt(q.size(2)) == sqrt(seq_len)
    # (not sqrt(head_dim)); reproduce that quirk exactly.
    scale = 1.0 / math.sqrt(seq_len)
    s = jnp.einsum("hld,hmd->hlm",
                   q.astype(jnp.bfloat16), k.astype(jnp.bfloat16),
                   preferred_element_type=jnp.float32) * scale          # (H, L, L)
    s = s - jnp.max(s, axis=-1, keepdims=True)
    p = jnp.exp(s)
    p = p * pl.reciprocal(jnp.sum(p, axis=-1, keepdims=True), approx=True)
    o = jnp.einsum("hlm,hmd->hld",
                   p.astype(jnp.bfloat16), v.astype(jnp.bfloat16),
                   preferred_element_type=jnp.float32)                  # (H, L, Dh)

    # Output projection, still batched over heads (wlv pre-shaped (H, Dh, E)),
    # then reduced over the head axis -- identical to concat(heads) @ wlv.
    part = jnp.einsum("hld,hde->hle", o.astype(jnp.bfloat16), wlv_ref[...],
                      preferred_element_type=jnp.float32)               # (H, L, E)
    y_attn = jnp.sum(part, axis=0) + blv_ref[...]                       # (L, E)
    y_res = y_attn * a1 + x                                             # residual 1

    # --- MLP branch -------------------------------------------------------------
    z = layer_norm(y_res, ln2w_ref[...], ln2b_ref[...])
    z = z * (1.0 + g2) + be2
    h1 = jnp.dot(z.astype(jnp.bfloat16), wf1_ref[...],
                 preferred_element_type=jnp.float32) + bf1_ref[...]     # (L, 4E)
    h1 = jnp.maximum(h1, 0.0)
    h2 = jnp.dot(h1.astype(jnp.bfloat16), wf2_ref[...],
                 preferred_element_type=jnp.float32) + bf2_ref[...]     # (L, E)
    out_ref[0] = h2 * a2 + y_res                                        # residual 2


# ----------------------------------------------------------------------------
# Wrapper
# ----------------------------------------------------------------------------
def dit_block_pallas(x, cond, params, head_num):
    B, L, E = x.shape
    H, Dh = head_num, E                  # per-head dim == embSize in this module
    assert cond.shape == (B, E)
    f32, bf16 = jnp.float32, jnp.bfloat16

    # --- hoisted + fused conditioning projections (one (B,E)x(E,6E) XLA matmul) ---
    w_mod = jnp.concatenate(
        [params[k] for k in ("wg1", "wb1", "wa1", "wg2", "wb2", "wa2")], axis=1)
    b_mod = jnp.concatenate(
        [params[k] for k in ("bg1", "bb1", "ba1", "bg2", "bb2", "ba2")], axis=1)
    mod = (cond @ w_mod + b_mod).reshape(B, 6, E).astype(f32)           # (B, 6, E)

    # --- weights: bf16 MXU operands; head axis made leading for q/k/v/lv -------
    def head_w(w):   # (E, H*Dh) -> (H, E, Dh)
        return jnp.transpose(w.reshape(E, H, Dh), (1, 0, 2)).astype(bf16)

    def head_b(b):   # (1, H*Dh) -> (H, 1, Dh)
        return b.reshape(H, 1, Dh).astype(f32)

    weights = [
        params["ln1w"].astype(f32), params["ln1b"].astype(f32),
        params["ln2w"].astype(f32), params["ln2b"].astype(f32),
        head_w(params["wq"]), head_b(params["bq"]),
        head_w(params["wk"]), head_b(params["bk"]),
        head_w(params["wv"]), head_b(params["bv"]),
        params["wlv"].reshape(H, Dh, E).astype(bf16), params["blv"].astype(f32),
        params["wf1"].astype(bf16), params["bf1"].astype(f32),
        params["wf2"].astype(bf16), params["bf2"].astype(f32),
    ]

    def full_spec(arr):
        nd = arr.ndim
        return pl.BlockSpec(arr.shape, lambda b, _nd=nd: (0,) * _nd)

    in_specs = (
        [pl.BlockSpec((1, L, E), lambda b: (b, 0, 0)),   # x: one batch row / step
         pl.BlockSpec((1, 6, E), lambda b: (b, 0, 0))]   # per-batch modulation vecs
        + [full_spec(w) for w in weights]                # weights: full blocks
    )
    out_spec = pl.BlockSpec((1, L, E), lambda b: (b, 0, 0))

    kernel = functools.partial(
        _dit_block_kernel, head_num=H, head_dim=Dh, seq_len=L)

    return pl.pallas_call(
        kernel,
        out_shape=jax.ShapeDtypeStruct((B, L, E), jnp.float32),
        grid_spec=pltpu.PrefetchScalarGridSpec(
            num_scalar_prefetch=0,
            grid=(B,),
            in_specs=in_specs,
            out_specs=out_spec,
        ),
        compiler_params=pltpu.CompilerParams(
            dimension_semantics=("parallel",),     # batch rows are independent
            vmem_limit_bytes=32 * 1024 * 1024,
        ),
    )(x, mod, *weights)


# ----------------------------------------------------------------------------
# Pure-JAX reference (mirrors the PyTorch forward exactly, f32 throughout)
# ----------------------------------------------------------------------------
def dit_block_ref(x, cond, params, head_num):
    B, L, E = x.shape
    p = params

    def lin(z, w, b):
        return z @ w + b[0]

    def layer_norm(z, w, b):
        mu = jnp.mean(z, axis=-1, keepdims=True)
        var = jnp.mean((z - mu) ** 2, axis=-1, keepdims=True)
        return (z - mu) / jnp.sqrt(var + 1e-5) * w[0] + b[0]

    g1 = lin(cond, p["wg1"], p["bg1"])[:, None, :]
    be1 = lin(cond, p["wb1"], p["bb1"])[:, None, :]
    a1 = lin(cond, p["wa1"], p["ba1"])[:, None, :]
    g2 = lin(cond, p["wg2"], p["bg2"])[:, None, :]
    be2 = lin(cond, p["wb2"], p["bb2"])[:, None, :]
    a2 = lin(cond, p["wa2"], p["ba2"])[:, None, :]

    y = layer_norm(x, p["ln1w"], p["ln1b"])
    y = y * (1 + g1) + be1

    q = lin(y, p["wq"], p["bq"]).reshape(B, L, head_num, E).transpose(0, 2, 1, 3)
    k = lin(y, p["wk"], p["bk"]).reshape(B, L, head_num, E).transpose(0, 2, 3, 1)
    v = lin(y, p["wv"], p["bv"]).reshape(B, L, head_num, E).transpose(0, 2, 1, 3)

    attn = (q @ k) / math.sqrt(L)          # q.size(2) == L in the PyTorch code
    attn = jax.nn.softmax(attn, axis=-1)
    y = attn @ v                           # (B, H, L, E)
    y = y.transpose(0, 2, 1, 3).reshape(B, L, head_num * E)
    y = lin(y, p["wlv"], p["blv"])
    y = y * a1 + x

    z = layer_norm(y, p["ln2w"], p["ln2b"])
    z = z * (1 + g2) + be2
    z = lin(jnp.maximum(lin(z, p["wf1"], p["bf1"]), 0.0), p["wf2"], p["bf2"])
    return z * a2 + y


# ----------------------------------------------------------------------------
# Deterministic parameter init (synthetic; matches the shapes in __init__)
# ----------------------------------------------------------------------------
def init_params(key, emb_size, head_num):
    E, H = emb_size, head_num
    names_shapes = {
        "wg1": (E, E), "bg1": (1, E),
        "wb1": (E, E), "bb1": (1, E),
        "wa1": (E, E), "ba1": (1, E),
        "wg2": (E, E), "bg2": (1, E),
        "wb2": (E, E), "bb2": (1, E),
        "wa2": (E, E), "ba2": (1, E),
        "wq": (E, H * E), "bq": (1, H * E),
        "wk": (E, H * E), "bk": (1, H * E),
        "wv": (E, H * E), "bv": (1, H * E),
        "wlv": (H * E, E), "blv": (1, E),
        "wf1": (E, 4 * E), "bf1": (1, 4 * E),
        "wf2": (4 * E, E), "bf2": (1, E),
    }
    params = {}
    keys = jax.random.split(key, len(names_shapes))
    for (name, shape), k in zip(sorted(names_shapes.items()), keys):
        params[name] = (0.05 * jax.random.normal(k, shape)).astype(jnp.float32)
    # LayerNorm affine params (PyTorch default init: weight=1, bias=0).
    params["ln1w"] = jnp.ones((1, E), jnp.float32)
    params["ln1b"] = jnp.zeros((1, E), jnp.float32)
    params["ln2w"] = jnp.ones((1, E), jnp.float32)
    params["ln2b"] = jnp.zeros((1, E), jnp.float32)
    return params


if __name__ == "__main__":
    B, L, E, H = 2, 8, 32, 2

    key = jax.random.PRNGKey(0)
    k_x, k_c, k_p = jax.random.split(key, 3)
    x = jax.random.normal(k_x, (B, L, E), dtype=jnp.float32)
    cond = jax.random.normal(k_c, (B, E), dtype=jnp.float32)
    params = init_params(k_p, E, H)

    out = dit_block_pallas(x, cond, params, head_num=H)
    out = jax.block_until_ready(out)

    ref = dit_block_ref(x, cond, params, head_num=H)
    ref = jax.block_until_ready(ref)

    assert out.shape == (B, L, E)
    # Tolerance accounts for bf16 matmul operands (f32 accumulation) in the kernel
    # vs. the pure-f32 reference.
    assert jnp.allclose(out, ref, atol=3e-2, rtol=3e-2), (
        f"max abs err = {jnp.max(jnp.abs(out - ref))}"
    )
    print("KERNEL_OK")
</pallas_src>

<mosaic_0001>
module attributes {stable_mosaic.version = 11 : i64} {
  func.func @_dit_block_kernel(%arg0: i32, %arg1: memref<1x8x32xf32, #tpu.memory_space<vmem>>, %arg2: memref<1x6x32xf32, #tpu.memory_space<vmem>>, %arg3: memref<1x32xf32, #tpu.memory_space<vmem>>, %arg4: memref<1x32xf32, #tpu.memory_space<vmem>>, %arg5: memref<1x32xf32, #tpu.memory_space<vmem>>, %arg6: memref<1x32xf32, #tpu.memory_space<vmem>>, %arg7: memref<2x32x32xbf16, #tpu.memory_space<vmem>>, %arg8: memref<2x1x32xf32, #tpu.memory_space<vmem>>, %arg9: memref<2x32x32xbf16, #tpu.memory_space<vmem>>, %arg10: memref<2x1x32xf32, #tpu.memory_space<vmem>>, %arg11: memref<2x32x32xbf16, #tpu.memory_space<vmem>>, %arg12: memref<2x1x32xf32, #tpu.memory_space<vmem>>, %arg13: memref<2x32x32xbf16, #tpu.memory_space<vmem>>, %arg14: memref<1x32xf32, #tpu.memory_space<vmem>>, %arg15: memref<32x128xbf16, #tpu.memory_space<vmem>>, %arg16: memref<1x128xf32, #tpu.memory_space<vmem>>, %arg17: memref<128x32xbf16, #tpu.memory_space<vmem>>, %arg18: memref<1x32xf32, #tpu.memory_space<vmem>>, %arg19: memref<1x8x32xf32, #tpu.memory_space<vmem>>) attributes {dimension_semantics = [#tpu.dimension_semantics<parallel>], iteration_bounds = array<i64: 2>, scalar_prefetch = 0 : i64, scratch_operands = 0 : i64, tpu.core_type = #tpu.core_type<tc>, window_params = [{transform_indices = @transform_0, window_bounds = array<i64: 1, 8, 32>}, {transform_indices = @transform_1, window_bounds = array<i64: 1, 6, 32>}, {pipeline_mode = #tpu.pipeline_mode<synchronous>, transform_indices = @transform_2, window_bounds = array<i64: 1, 32>}, {pipeline_mode = #tpu.pipeline_mode<synchronous>, transform_indices = @transform_3, window_bounds = array<i64: 1, 32>}, {pipeline_mode = #tpu.pipeline_mode<synchronous>, transform_indices = @transform_4, window_bounds = array<i64: 1, 32>}, {pipeline_mode = #tpu.pipeline_mode<synchronous>, transform_indices = @transform_5, window_bounds = array<i64: 1, 32>}, {pipeline_mode = #tpu.pipeline_mode<synchronous>, transform_indices = @transform_6, window_bounds = array<i64: 2, 32, 32>}, {pipeline_mode = #tpu.pipeline_mode<synchronous>, transform_indices = @transform_7, window_bounds = array<i64: 2, 1, 32>}, {pipeline_mode = #tpu.pipeline_mode<synchronous>, transform_indices = @transform_8, window_bounds = array<i64: 2, 32, 32>}, {pipeline_mode = #tpu.pipeline_mode<synchronous>, transform_indices = @transform_9, window_bounds = array<i64: 2, 1, 32>}, {pipeline_mode = #tpu.pipeline_mode<synchronous>, transform_indices = @transform_10, window_bounds = array<i64: 2, 32, 32>}, {pipeline_mode = #tpu.pipeline_mode<synchronous>, transform_indices = @transform_11, window_bounds = array<i64: 2, 1, 32>}, {pipeline_mode = #tpu.pipeline_mode<synchronous>, transform_indices = @transform_12, window_bounds = array<i64: 2, 32, 32>}, {pipeline_mode = #tpu.pipeline_mode<synchronous>, transform_indices = @transform_13, window_bounds = array<i64: 1, 32>}, {pipeline_mode = #tpu.pipeline_mode<synchronous>, transform_indices = @transform_14, window_bounds = array<i64: 32, 128>}, {pipeline_mode = #tpu.pipeline_mode<synchronous>, transform_indices = @transform_15, window_bounds = array<i64: 1, 128>}, {pipeline_mode = #tpu.pipeline_mode<synchronous>, transform_indices = @transform_16, window_bounds = array<i64: 128, 32>}, {pipeline_mode = #tpu.pipeline_mode<synchronous>, transform_indices = @transform_17, window_bounds = array<i64: 1, 32>}, {transform_indices = @transform_18, window_bounds = array<i64: 1, 8, 32>}]} {
    %c0 = arith.constant 0 : index
    %c0_0 = arith.constant 0 : index
    %c0_1 = arith.constant 0 : index
    %0 = vector.load %arg1[%c0, %c0_0, %c0_1] : memref<1x8x32xf32, #tpu.memory_space<vmem>>, vector<1x8x32xf32>
    %1 = vector.shape_cast %0 : vector<1x8x32xf32> to vector<8x32xf32>
    %c0_2 = arith.constant 0 : index
    %c0_3 = arith.constant 0 : index
    %c0_4 = arith.constant 0 : index
    %2 = vector.load %arg2[%c0_2, %c0_3, %c0_4] : memref<1x6x32xf32, #tpu.memory_space<vmem>>, vector<1x6x32xf32>
    %3 = vector.shape_cast %2 : vector<1x6x32xf32> to vector<6x32xf32>
    %4 = vector.extract_strided_slice %3 {offsets = [0, 0], sizes = [1, 32], strides = [1, 1]} : vector<6x32xf32> to vector<1x32xf32>
    %5 = vector.extract_strided_slice %3 {offsets = [1, 0], sizes = [1, 32], strides = [1, 1]} : vector<6x32xf32> to vector<1x32xf32>
    %6 = vector.extract_strided_slice %3 {offsets = [2, 0], sizes = [1, 32], strides = [1, 1]} : vector<6x32xf32> to vector<1x32xf32>
    %7 = vector.extract_strided_slice %3 {offsets = [3, 0], sizes = [1, 32], strides = [1, 1]} : vector<6x32xf32> to vector<1x32xf32>
    %8 = vector.extract_strided_slice %3 {offsets = [4, 0], sizes = [1, 32], strides = [1, 1]} : vector<6x32xf32> to vector<1x32xf32>
    %9 = vector.extract_strided_slice %3 {offsets = [5, 0], sizes = [1, 32], strides = [1, 1]} : vector<6x32xf32> to vector<1x32xf32>
    %c0_5 = arith.constant 0 : index
    %c0_6 = arith.constant 0 : index
    %10 = vector.load %arg3[%c0_5, %c0_6] : memref<1x32xf32, #tpu.memory_space<vmem>>, vector<1x32xf32>
    %c0_7 = arith.constant 0 : index
    %c0_8 = arith.constant 0 : index
    %11 = vector.load %arg4[%c0_7, %c0_8] : memref<1x32xf32, #tpu.memory_space<vmem>>, vector<1x32xf32>
    %cst = arith.constant dense<0.000000e+00> : vector<8xf32>
    %12 = vector.multi_reduction <add>, %1, %cst [1] : vector<8x32xf32> to vector<8xf32>
    %13 = vector.shape_cast %12 : vector<8xf32> to vector<8x1xf32>
    %cst_9 = arith.constant 3.200000e+01 : f32
    %14 = vector.broadcast %cst_9 : f32 to vector<8x1xf32>
    %15 = arith.divf %13, %14 : vector<8x1xf32>
    %16 = vector.broadcast %15 : vector<8x1xf32> to vector<8x32xf32>
    %17 = arith.subf %1, %16 : vector<8x32xf32>
    %18 = arith.mulf %17, %17 : vector<8x32xf32>
    %cst_10 = arith.constant dense<0.000000e+00> : vector<8xf32>
    %19 = vector.multi_reduction <add>, %18, %cst_10 [1] : vector<8x32xf32> to vector<8xf32>
    %20 = vector.shape_cast %19 : vector<8xf32> to vector<8x1xf32>
    %cst_11 = arith.constant 3.200000e+01 : f32
    %21 = vector.broadcast %cst_11 : f32 to vector<8x1xf32>
    %22 = arith.divf %20, %21 : vector<8x1xf32>
    %23 = vector.broadcast %15 : vector<8x1xf32> to vector<8x32xf32>
    %24 = arith.subf %1, %23 : vector<8x32xf32>
    %cst_12 = arith.constant 9.99999974E-6 : f32
    %25 = vector.broadcast %cst_12 : f32 to vector<8x1xf32>
    %26 = arith.addf %22, %25 : vector<8x1xf32>
    %27 = math.rsqrt %26 : vector<8x1xf32>
    %28 = vector.broadcast %27 : vector<8x1xf32> to vector<8x32xf32>
    %29 = arith.mulf %24, %28 : vector<8x32xf32>
    %30 = vector.broadcast %10 : vector<1x32xf32> to vector<8x32xf32>
    %31 = arith.mulf %29, %30 : vector<8x32xf32>
    %32 = vector.broadcast %11 : vector<1x32xf32> to vector<8x32xf32>
    %33 = arith.addf %31, %32 : vector<8x32xf32>
    %cst_13 = arith.constant 1.000000e+00 : f32
    %34 = vector.broadcast %cst_13 : f32 to vector<1x32xf32>
    %35 = arith.addf %34, %4 : vector<1x32xf32>
    %36 = vector.broadcast %35 : vector<1x32xf32> to vector<8x32xf32>
    %37 = arith.mulf %33, %36 : vector<8x32xf32>
    %38 = vector.broadcast %5 : vector<1x32xf32> to vector<8x32xf32>
    %39 = arith.addf %37, %38 : vector<8x32xf32>
    %40 = arith.truncf %39 : vector<8x32xf32> to vector<8x32xbf16>
    %41 = vector.shape_cast %40 : vector<8x32xbf16> to vector<1x8x32xbf16>
    %42 = vector.shape_cast %41 : vector<1x8x32xbf16> to vector<1x8x32xbf16>
    %43 = vector.broadcast %42 : vector<1x8x32xbf16> to vector<2x8x32xbf16>
    %c0_14 = arith.constant 0 : index
    %c0_15 = arith.constant 0 : index
    %c0_16 = arith.constant 0 : index
    %44 = vector.load %arg7[%c0_14, %c0_15, %c0_16] : memref<2x32x32xbf16, #tpu.memory_space<vmem>>, vector<2x32x32xbf16>
    "tpu.trace_start"() <{level = 10 : i32, message = "hle,hed->hld"}> : () -> ()
    %cst_17 = arith.constant dense<0.000000e+00> : vector<2x8x32xf32>
    %45 = tpu.matmul %43, %44, %cst_17 {dimension_numbers = #tpu.dot_dimension_numbers<[2], [1], [1], [2], [0, 0, 0, 1, 1, 2], [0], [0]>} : vector<2x8x32xbf16>, vector<2x32x32xbf16>, vector<2x8x32xf32> -> vector<2x8x32xf32>
    "tpu.trace_stop"() : () -> ()
    %c0_18 = arith.constant 0 : index
    %c0_19 = arith.constant 0 : index
    %c0_20 = arith.constant 0 : index
    %46 = vector.load %arg8[%c0_18, %c0_19, %c0_20] : memref<2x1x32xf32, #tpu.memory_space<vmem>>, vector<2x1x32xf32>
    %47 = vector.broadcast %46 : vector<2x1x32xf32> to vector<2x8x32xf32>
    %48 = arith.addf %45, %47 : vector<2x8x32xf32>
    %c0_21 = arith.constant 0 : index
    %c0_22 = arith.constant 0 : index
    %c0_23 = arith.constant 0 : index
    %49 = vector.load %arg9[%c0_21, %c0_22, %c0_23] : memref<2x32x32xbf16, #tpu.memory_space<vmem>>, vector<2x32x32xbf16>
    "tpu.trace_start"() <{level = 10 : i32, message = "hle,hed->hld"}> : () -> ()
    %cst_24 = arith.constant dense<0.000000e+00> : vector<2x8x32xf32>
    %50 = tpu.matmul %43, %49, %cst_24 {dimension_numbers = #tpu.dot_dimension_numbers<[2], [1], [1], [2], [0, 0, 0, 1, 1, 2], [0], [0]>} : vector<2x8x32xbf16>, vector<2x32x32xbf16>, vector<2x8x32xf32> -> vector<2x8x32xf32>
    "tpu.trace_stop"() : () -> ()
    %c0_25 = arith.constant 0 : index
    %c0_26 = arith.constant 0 : index
    %c0_27 = arith.constant 0 : index
    %51 = vector.load %arg10[%c0_25, %c0_26, %c0_27] : memref<2x1x32xf32, #tpu.memory_space<vmem>>, vector<2x1x32xf32>
    %52 = vector.broadcast %51 : vector<2x1x32xf32> to vector<2x8x32xf32>
    %53 = arith.addf %50, %52 : vector<2x8x32xf32>
    %c0_28 = arith.constant 0 : index
    %c0_29 = arith.constant 0 : index
    %c0_30 = arith.constant 0 : index
    %54 = vector.load %arg11[%c0_28, %c0_29, %c0_30] : memref<2x32x32xbf16, #tpu.memory_space<vmem>>, vector<2x32x32xbf16>
    "tpu.trace_start"() <{level = 10 : i32, message = "hle,hed->hld"}> : () -> ()
    %cst_31 = arith.constant dense<0.000000e+00> : vector<2x8x32xf32>
    %55 = tpu.matmul %43, %54, %cst_31 {dimension_numbers = #tpu.dot_dimension_numbers<[2], [1], [1], [2], [0, 0, 0, 1, 1, 2], [0], [0]>} : vector<2x8x32xbf16>, vector<2x32x32xbf16>, vector<2x8x32xf32> -> vector<2x8x32xf32>
    "tpu.trace_stop"() : () -> ()
    %c0_32 = arith.constant 0 : index
    %c0_33 = arith.constant 0 : index
    %c0_34 = arith.constant 0 : index
    %56 = vector.load %arg12[%c0_32, %c0_33, %c0_34] : memref<2x1x32xf32, #tpu.memory_space<vmem>>, vector<2x1x32xf32>
    %57 = vector.broadcast %56 : vector<2x1x32xf32> to vector<2x8x32xf32>
    %58 = arith.addf %55, %57 : vector<2x8x32xf32>
    %59 = arith.truncf %48 : vector<2x8x32xf32> to vector<2x8x32xbf16>
    %60 = arith.truncf %53 : vector<2x8x32xf32> to vector<2x8x32xbf16>
    "tpu.trace_start"() <{level = 10 : i32, message = "hld,hmd->hlm"}> : () -> ()
    %cst_35 = arith.constant dense<0.000000e+00> : vector<2x8x8xf32>
    %61 = tpu.matmul %59, %60, %cst_35 {dimension_numbers = #tpu.dot_dimension_numbers<[2], [2], [1], [1], [0, 0, 0, 1, 1, 1], [0], [0]>} : vector<2x8x32xbf16>, vector<2x8x32xbf16>, vector<2x8x8xf32> -> vector<2x8x8xf32>
    "tpu.trace_stop"() : () -> ()
    %cst_36 = arith.constant 0.353553385 : f32
    %62 = vector.broadcast %cst_36 : f32 to vector<2x8x8xf32>
    %63 = arith.mulf %61, %62 : vector<2x8x8xf32>
    %cst_37 = arith.constant dense<0xFF800000> : vector<2x8xf32>
    %64 = vector.multi_reduction <maximumf>, %63, %cst_37 [2] : vector<2x8x8xf32> to vector<2x8xf32>
    %65 = vector.shape_cast %64 : vector<2x8xf32> to vector<2x8x1xf32>
    %66 = vector.broadcast %65 : vector<2x8x1xf32> to vector<2x8x8xf32>
    %67 = arith.subf %63, %66 : vector<2x8x8xf32>
    %68 = math.exp %67 : vector<2x8x8xf32>
    %cst_38 = arith.constant dense<0.000000e+00> : vector<2x8xf32>
    %69 = vector.multi_reduction <add>, %68, %cst_38 [2] : vector<2x8x8xf32> to vector<2x8xf32>
    %70 = vector.shape_cast %69 : vector<2x8xf32> to vector<2x8x1xf32>
    %71 = tpu.reciprocal %70 {approx = true} : vector<2x8x1xf32> -> vector<2x8x1xf32>
    %72 = vector.broadcast %71 : vector<2x8x1xf32> to vector<2x8x8xf32>
    %73 = arith.mulf %68, %72 : vector<2x8x8xf32>
    %74 = arith.truncf %73 : vector<2x8x8xf32> to vector<2x8x8xbf16>
    %75 = arith.truncf %58 : vector<2x8x32xf32> to vector<2x8x32xbf16>
    "tpu.trace_start"() <{level = 10 : i32, message = "hlm,hmd->hld"}> : () -> ()
    %cst_39 = arith.constant dense<0.000000e+00> : vector<2x8x32xf32>
    %76 = tpu.matmul %74, %75, %cst_39 {dimension_numbers = #tpu.dot_dimension_numbers<[2], [1], [1], [2], [0, 0, 0, 1, 1, 2], [0], [0]>} : vector<2x8x8xbf16>, vector<2x8x32xbf16>, vector<2x8x32xf32> -> vector<2x8x32xf32>
    "tpu.trace_stop"() : () -> ()
    %77 = arith.truncf %76 : vector<2x8x32xf32> to vector<2x8x32xbf16>
    %c0_40 = arith.constant 0 : index
    %c0_41 = arith.constant 0 : index
    %c0_42 = arith.constant 0 : index
    %78 = vector.load %arg13[%c0_40, %c0_41, %c0_42] : memref<2x32x32xbf16, #tpu.memory_space<vmem>>, vector<2x32x32xbf16>
    "tpu.trace_start"() <{level = 10 : i32, message = "hld,hde->hle"}> : () -> ()
    %cst_43 = arith.constant dense<0.000000e+00> : vector<2x8x32xf32>
    %79 = tpu.matmul %77, %78, %cst_43 {dimension_numbers = #tpu.dot_dimension_numbers<[2], [1], [1], [2], [0, 0, 0, 1, 1, 2], [0], [0]>} : vector<2x8x32xbf16>, vector<2x32x32xbf16>, vector<2x8x32xf32> -> vector<2x8x32xf32>
    "tpu.trace_stop"() : () -> ()
    %cst_44 = arith.constant dense<0.000000e+00> : vector<8x32xf32>
    %80 = vector.multi_reduction <add>, %79, %cst_44 [0] : vector<2x8x32xf32> to vector<8x32xf32>
    %c0_45 = arith.constant 0 : index
    %c0_46 = arith.constant 0 : index
    %81 = vector.load %arg14[%c0_45, %c0_46] : memref<1x32xf32, #tpu.memory_space<vmem>>, vector<1x32xf32>
    %82 = vector.broadcast %81 : vector<1x32xf32> to vector<8x32xf32>
    %83 = arith.addf %80, %82 : vector<8x32xf32>
    %84 = vector.broadcast %6 : vector<1x32xf32> to vector<8x32xf32>
    %85 = arith.mulf %83, %84 : vector<8x32xf32>
    %86 = arith.addf %85, %1 : vector<8x32xf32>
    %c0_47 = arith.constant 0 : index
    %c0_48 = arith.constant 0 : index
    %87 = vector.load %arg5[%c0_47, %c0_48] : memref<1x32xf32, #tpu.memory_space<vmem>>, vector<1x32xf32>
    %c0_49 = arith.constant 0 : index
    %c0_50 = arith.constant 0 : index
    %88 = vector.load %arg6[%c0_49, %c0_50] : memref<1x32xf32, #tpu.memory_space<vmem>>, vector<1x32xf32>
    %cst_51 = arith.constant dense<0.000000e+00> : vector<8xf32>
    %89 = vector.multi_reduction <add>, %86, %cst_51 [1] : vector<8x32xf32> to vector<8xf32>
    %90 = vector.shape_cast %89 : vector<8xf32> to vector<8x1xf32>
    %cst_52 = arith.constant 3.200000e+01 : f32
    %91 = vector.broadcast %cst_52 : f32 to vector<8x1xf32>
    %92 = arith.divf %90, %91 : vector<8x1xf32>
    %93 = vector.broadcast %92 : vector<8x1xf32> to vector<8x32xf32>
    %94 = arith.subf %86, %93 : vector<8x32xf32>
    %95 = arith.mulf %94, %94 : vector<8x32xf32>
    %cst_53 = arith.constant dense<0.000000e+00> : vector<8xf32>
    %96 = vector.multi_reduction <add>, %95, %cst_53 [1] : vector<8x32xf32> to vector<8xf32>
    %97 = vector.shape_cast %96 : vector<8xf32> to vector<8x1xf32>
    %cst_54 = arith.constant 3.200000e+01 : f32
    %98 = vector.broadcast %cst_54 : f32 to vector<8x1xf32>
    %99 = arith.divf %97, %98 : vector<8x1xf32>
    %100 = vector.broadcast %92 : vector<8x1xf32> to vector<8x32xf32>
    %101 = arith.subf %86, %100 : vector<8x32xf32>
    %cst_55 = arith.constant 9.99999974E-6 : f32
    %102 = vector.broadcast %cst_55 : f32 to vector<8x1xf32>
    %103 = arith.addf %99, %102 : vector<8x1xf32>
    %104 = math.rsqrt %103 : vector<8x1xf32>
    %105 = vector.broadcast %104 : vector<8x1xf32> to vector<8x32xf32>
    %106 = arith.mulf %101, %105 : vector<8x32xf32>
    %107 = vector.broadcast %87 : vector<1x32xf32> to vector<8x32xf32>
    %108 = arith.mulf %106, %107 : vector<8x32xf32>
    %109 = vector.broadcast %88 : vector<1x32xf32> to vector<8x32xf32>
    %110 = arith.addf %108, %109 : vector<8x32xf32>
    %cst_56 = arith.constant 1.000000e+00 : f32
    %111 = vector.broadcast %cst_56 : f32 to vector<1x32xf32>
    %112 = arith.addf %111, %7 : vector<1x32xf32>
    %113 = vector.broadcast %112 : vector<1x32xf32> to vector<8x32xf32>
    %114 = arith.mulf %110, %113 : vector<8x32xf32>
    %115 = vector.broadcast %8 : vector<1x32xf32> to vector<8x32xf32>
    %116 = arith.addf %114, %115 : vector<8x32xf32>
    %117 = arith.truncf %116 : vector<8x32xf32> to vector<8x32xbf16>
    %c0_57 = arith.constant 0 : index
    %c0_58 = arith.constant 0 : index
    %118 = vector.load %arg15[%c0_57, %c0_58] : memref<32x128xbf16, #tpu.memory_space<vmem>>, vector<32x128xbf16>
    %cst_59 = arith.constant dense<0.000000e+00> : vector<8x128xf32>
    %119 = tpu.matmul %117, %118, %cst_59 {dimension_numbers = #tpu.dot_dimension_numbers<[1], [0], [0], [1], [0, 0, 1, 1], [], []>} : vector<8x32xbf16>, vector<32x128xbf16>, vector<8x128xf32> -> vector<8x128xf32>
    %c0_60 = arith.constant 0 : index
    %c0_61 = arith.constant 0 : index
    %120 = vector.load %arg16[%c0_60, %c0_61] : memref<1x128xf32, #tpu.memory_space<vmem>>, vector<1x128xf32>
    %121 = vector.broadcast %120 : vector<1x128xf32> to vector<8x128xf32>
    %122 = arith.addf %119, %121 : vector<8x128xf32>
    %cst_62 = arith.constant 0.000000e+00 : f32
    %123 = vector.broadcast %cst_62 : f32 to vector<8x128xf32>
    %124 = arith.maximumf %122, %123 : vector<8x128xf32>
    %125 = arith.truncf %124 : vector<8x128xf32> to vector<8x128xbf16>
    %c0_63 = arith.constant 0 : index
    %c0_64 = arith.constant 0 : index
    %126 = vector.load %arg17[%c0_63, %c0_64] : memref<128x32xbf16, #tpu.memory_space<vmem>>, vector<128x32xbf16>
    %cst_65 = arith.constant dense<0.000000e+00> : vector<8x32xf32>
    %127 = tpu.matmul %125, %126, %cst_65 {dimension_numbers = #tpu.dot_dimension_numbers<[1], [0], [0], [1], [0, 0, 1, 1], [], []>} : vector<8x128xbf16>, vector<128x32xbf16>, vector<8x32xf32> -> vector<8x32xf32>
    %c0_66 = arith.constant 0 : index
    %c0_67 = arith.constant 0 : index
    %128 = vector.load %arg18[%c0_66, %c0_67] : memref<1x32xf32, #tpu.memory_space<vmem>>, vector<1x32xf32>
    %129 = vector.broadcast %128 : vector<1x32xf32> to vector<8x32xf32>
    %130 = arith.addf %127, %129 : vector<8x32xf32>
    %131 = vector.broadcast %9 : vector<1x32xf32> to vector<8x32xf32>
    %132 = arith.mulf %130, %131 : vector<8x32xf32>
    %133 = arith.addf %132, %86 : vector<8x32xf32>
    %c0_68 = arith.constant 0 : index
    %c0_69 = arith.constant 0 : index
    %c0_70 = arith.constant 0 : index
    %134 = vector.load %arg19[%c0_68, %c0_69, %c0_70] : memref<1x8x32xf32, #tpu.memory_space<vmem>>, vector<1x8x32xf32>
    %135 = vector.shape_cast %134 : vector<1x8x32xf32> to vector<8x32xf32>
    %136 = vector.shape_cast %133 : vector<8x32xf32> to vector<1x8x32xf32>
    tpu.vector_store %arg19[%c0_68, %c0_69, %c0_70], %136 {strides = array<i32>} : memref<1x8x32xf32, #tpu.memory_space<vmem>>, vector<1x8x32xf32>,
    return
  }
  func.func @transform_0(%arg0: i32) -> (i32, i32, i32) {
    %c0_i32 = arith.constant 0 : i32
    %c0_i32_0 = arith.constant 0 : i32
    %c0_i32_1 = arith.constant 0 : i32
    return %arg0, %c0_i32, %c0_i32_0 : i32, i32, i32
  }
  func.func @transform_1(%arg0: i32) -> (i32, i32, i32) {
    %c0_i32 = arith.constant 0 : i32
    %c0_i32_0 = arith.constant 0 : i32
    %c0_i32_1 = arith.constant 0 : i32
    return %arg0, %c0_i32, %c0_i32_0 : i32, i32, i32
  }
  func.func @transform_2(%arg0: i32) -> (i32, i32) {
    %c0_i32 = arith.constant 0 : i32
    %c0_i32_0 = arith.constant 0 : i32
    %c0_i32_1 = arith.constant 0 : i32
    return %c0_i32, %c0_i32_0 : i32, i32
  }
  func.func @transform_3(%arg0: i32) -> (i32, i32) {
    %c0_i32 = arith.constant 0 : i32
    %c0_i32_0 = arith.constant 0 : i32
    %c0_i32_1 = arith.constant 0 : i32
    return %c0_i32, %c0_i32_0 : i32, i32
  }
  func.func @transform_4(%arg0: i32) -> (i32, i32) {
    %c0_i32 = arith.constant 0 : i32
    %c0_i32_0 = arith.constant 0 : i32
    %c0_i32_1 = arith.constant 0 : i32
    return %c0_i32, %c0_i32_0 : i32, i32
  }
  func.func @transform_5(%arg0: i32) -> (i32, i32) {
    %c0_i32 = arith.constant 0 : i32
    %c0_i32_0 = arith.constant 0 : i32
    %c0_i32_1 = arith.constant 0 : i32
    return %c0_i32, %c0_i32_0 : i32, i32
  }
  func.func @transform_6(%arg0: i32) -> (i32, i32, i32) {
    %c0_i32 = arith.constant 0 : i32
    %c0_i32_0 = arith.constant 0 : i32
    %c0_i32_1 = arith.constant 0 : i32
    %c0_i32_2 = arith.constant 0 : i32
    return %c0_i32, %c0_i32_0, %c0_i32_1 : i32, i32, i32
  }
  func.func @transform_7(%arg0: i32) -> (i32, i32, i32) {
    %c0_i32 = arith.constant 0 : i32
    %c0_i32_0 = arith.constant 0 : i32
    %c0_i32_1 = arith.constant 0 : i32
    %c0_i32_2 = arith.constant 0 : i32
    return %c0_i32, %c0_i32_0, %c0_i32_1 : i32, i32, i32
  }
  func.func @transform_8(%arg0: i32) -> (i32, i32, i32) {
    %c0_i32 = arith.constant 0 : i32
    %c0_i32_0 = arith.constant 0 : i32
    %c0_i32_1 = arith.constant 0 : i32
    %c0_i32_2 = arith.constant 0 : i32
    return %c0_i32, %c0_i32_0, %c0_i32_1 : i32, i32, i32
  }
  func.func @transform_9(%arg0: i32) -> (i32, i32, i32) {
    %c0_i32 = arith.constant 0 : i32
    %c0_i32_0 = arith.constant 0 : i32
    %c0_i32_1 = arith.constant 0 : i32
    %c0_i32_2 = arith.constant 0 : i32
    return %c0_i32, %c0_i32_0, %c0_i32_1 : i32, i32, i32
  }
  func.func @transform_10(%arg0: i32) -> (i32, i32, i32) {
    %c0_i32 = arith.constant 0 : i32
    %c0_i32_0 = arith.constant 0 : i32
    %c0_i32_1 = arith.constant 0 : i32
    %c0_i32_2 = arith.constant 0 : i32
    return %c0_i32, %c0_i32_0, %c0_i32_1 : i32, i32, i32
  }
  func.func @transform_11(%arg0: i32) -> (i32, i32, i32) {
    %c0_i32 = arith.constant 0 : i32
    %c0_i32_0 = arith.constant 0 : i32
    %c0_i32_1 = arith.constant 0 : i32
    %c0_i32_2 = arith.constant 0 : i32
    return %c0_i32, %c0_i32_0, %c0_i32_1 : i32, i32, i32
  }
  func.func @transform_12(%arg0: i32) -> (i32, i32, i32) {
    %c0_i32 = arith.constant 0 : i32
    %c0_i32_0 = arith.constant 0 : i32
    %c0_i32_1 = arith.constant 0 : i32
    %c0_i32_2 = arith.constant 0 : i32
    return %c0_i32, %c0_i32_0, %c0_i32_1 : i32, i32, i32
  }
  func.func @transform_13(%arg0: i32) -> (i32, i32) {
    %c0_i32 = arith.constant 0 : i32
    %c0_i32_0 = arith.constant 0 : i32
    %c0_i32_1 = arith.constant 0 : i32
    return %c0_i32, %c0_i32_0 : i32, i32
  }
  func.func @transform_14(%arg0: i32) -> (i32, i32) {
    %c0_i32 = arith.constant 0 : i32
    %c0_i32_0 = arith.constant 0 : i32
    %c0_i32_1 = arith.constant 0 : i32
    return %c0_i32, %c0_i32_0 : i32, i32
  }
  func.func @transform_15(%arg0: i32) -> (i32, i32) {
    %c0_i32 = arith.constant 0 : i32
    %c0_i32_0 = arith.constant 0 : i32
    %c0_i32_1 = arith.constant 0 : i32
    return %c0_i32, %c0_i32_0 : i32, i32
  }
  func.func @transform_16(%arg0: i32) -> (i32, i32) {
    %c0_i32 = arith.constant 0 : i32
    %c0_i32_0 = arith.constant 0 : i32
    %c0_i32_1 = arith.constant 0 : i32
    return %c0_i32, %c0_i32_0 : i32, i32
  }
  func.func @transform_17(%arg0: i32) -> (i32, i32) {
    %c0_i32 = arith.constant 0 : i32
    %c0_i32_0 = arith.constant 0 : i32
    %c0_i32_1 = arith.constant 0 : i32
    return %c0_i32, %c0_i32_0 : i32, i32
  }
  func.func @transform_18(%arg0: i32) -> (i32, i32, i32) {
    %c0_i32 = arith.constant 0 : i32
    %c0_i32_0 = arith.constant 0 : i32
    %c0_i32_1 = arith.constant 0 : i32
    return %arg0, %c0_i32, %c0_i32_0 : i32, i32, i32
  }
}

</mosaic_0001>

<bundles_post_ra>
// kernel: tpu_custom_call.1
= control target key start
LH: loop header
LB: loop body
LE: loop exit
PB: predicated region body
PF: predicated region fallthrough
CT: control target
= control target key end

     0   :  { %s2379_s0 = inlined_call_operand.vmem [shape: f32[2,8,32], index: 0, kind: input, shape index: {}]   ;;  %s2380_s1 = inlined_call_operand.vmem [shape: f32[2,6,32], index: 1, kind: input, shape index: {}]   ;;  %s2381_s2 = inlined_call_operand.vmem [shape: f32[1,32], index: 2, kind: input, shape index: {}]   ;;  %s2382_s3 = inlined_call_operand.hbm [shape: f32[1,32], index: 3, kind: input, shape index: {}]   ;;  %s2383_s4 = inlined_call_operand.hbm [shape: f32[1,32], index: 4, kind: input, shape index: {}]   ;;  %s2384_s5 = inlined_call_operand.hbm [shape: f32[1,32], index: 5, kind: input, shape index: {}]   ;;  %s2385_s6 = inlined_call_operand.vmem [shape: bf16[2,32,32], index: 6, kind: input, shape index: {}]   ;;  %s2386_s7 = inlined_call_operand.hbm [shape: f32[2,1,32], index: 7, kind: input, shape index: {}]   ;;  %s2387_s8 = inlined_call_operand.vmem [shape: bf16[2,32,32], index: 8, kind: input, shape index: {}]   ;;  %s2388_s9 = inlined_call_operand.vmem [shape: f32[2,1,32], index: 9, kind: input, shape index: {}]   ;;  %s2389_s10 = inlined_call_operand.hbm [shape: bf16[2,32,32], index: 10, kind: input, shape index: {}]   ;;  %s2390_s11 = inlined_call_operand.vmem [shape: f32[2,1,32], index: 11, kind: input, shape index: {}]   ;;  %s2391_s12 = inlined_call_operand.hbm [shape: bf16[2,32,32], index: 12, kind: input, shape index: {}]   ;;  %s2392_s13 = inlined_call_operand.vmem [shape: f32[1,32], index: 13, kind: input, shape index: {}]   ;;  %s2393_s14 = inlined_call_operand.vmem [shape: bf16[32,128], index: 14, kind: input, shape index: {}]   ;;  %s2394_s15 = inlined_call_operand.vmem [shape: f32[1,128], index: 15, kind: input, shape index: {}]   ;;  %s2395_s16 = inlined_call_operand.vmem [shape: bf16[128,32], index: 16, kind: input, shape index: {}]   ;;  %s2396_s17 = inlined_call_operand.vmem [shape: f32[1,32], index: 17, kind: input, shape index: {}]   ;;  %s2397_s18 = inlined_call_operand.hbm [shape: f32[2,8,32], index: 18, kind: output, shape index: {}]  }
   0x1   :  { %2407 = sst [smem:[#allocation26_spill]] %s2379_s0 }
   0x2   :  { %2408 = sst [smem:[#allocation27_spill]] %s2380_s1 }
   0x3   :  { %2409 = sst [smem:[#allocation28_spill]] %s2381_s2 }
   0x4   :  { %2410 = sst [smem:[#allocation29_spill]] %s2383_s4 }
   0x5   :  { %2411 = sst [smem:[#allocation30_spill]] %s2386_s7 }
   0x6   :  { %2412 = sst [smem:[#allocation31_spill]] %s2396_s17 }
   0x7   :  { %2413 = sst [smem:[#allocation32_spill]] %s2397_s18 }
   0x8   :  { %23 = vsyncpa [#allocation3], 0 }
   0x9   :  { %24 = vsyncpa [#allocation6], 0 }
   0xa   :  { %25 = vsyncpa [#allocation9], 0 }
   0xb   :  { %26 = vsyncpa [#allocation12], 0 }
   0xc   :  { %27 = vsyncpa [#allocation4], 0 }
   0xd   :  { %29 = vsyncpa [#allocation4 + $0x1], 0  ;;  %s2090_s27 = smov 0   ;;  %s2092_s28 = smov 0  }
   0xe   :  { %s2094_s29 = smov 0   ;;  %s2096_s30 = smov 0  }
   0xf LB: > { %2414 = sst [smem:[#allocation19_spill]] %s1970_s27  ;;  %s2111_s0 = sadd.s32 4294967295, %s1982_s30   ;;  %s1982_s30 = sphi %s2096_s30, %s2436_s30   ;;  %s1978_s29 = sphi %s2094_s29, %s2438_s29   ;;  %s1974_s28 = sphi %s2092_s28, %s2440_s28   ;;  %s1970_s27 = sphi %s2090_s27, %s2439_s27  }
  0x10   : > { %2415 = sst [smem:[#allocation20_spill]] %s1978_s29  ;;  %s1426_s19 = sadd.s32 4294967294, %s1982_s30  }
  0x11   : > { %2416 = sst [smem:[#allocation21_spill]] %s1982_s30  ;;  %s2115_s1 = sadd.s32 1, %s1982_s30  }
  0x12   : > { %2417 = sst [smem:[#allocation22_spill]] %s2115_s1  ;;  %s430_s20 = sadd.s32 1, %s1978_s29 }
  0x13   : > { %s427_s21 = ssub.s32 %s1982_s30, %s2115_s1  ;;  %p440_p0 = scmp.ne.s32.totalorder %s1978_s29, %s1974_s28 }
  0x14   : > { %p428_p1 = scmp.eq.s32.totalorder %s427_s21, 0  ;;  %p441_p2 = scmp.eq.s32.totalorder %s2111_s0, 1 }
  0x15   : > { %p446_p3 = scmp.ne.s32.totalorder %s1974_s28, %s1970_s27  ;;  %p447_p4 = scmp.eq.s32.totalorder %s1426_s19, 1 }
  0x16   : > { %s2126_s22 = scalar_select %p428_p1, %s1978_s29, %s430_s20  }
  0x17   : > { %p2128_p5 = por %p441_p2, %p440_p0  ;;  %p2132_p6 = por %p447_p4, %p446_p3 }
  0x18   : > { %2418 = sst [smem:[#allocation23_spill]] %s2126_s22  ;;  %p1427_p7 = scmp.ge.s32.totalorder %s1982_s30, 1 }
  0x19   : > { %s2419_s2 = scalar_select %p2128_p5, 1, 0 }
  0x1a   : > { %s2421_s23 = scalar_select %p2132_p6, 1, 0 }
  0x1b   : > { %2420 = sst [smem:[#allocation24_spill]] %s2419_s2  ;;  %p454_p8 = scmp.lt.s32.totalorder %s1982_s30, 3 }
  0x1c   : > { %2422 = sst [smem:[#allocation25_spill]] %s2421_s23  ;;  %p1641_p9 = scmp.eq.s32.totalorder %s2111_s0, 0 }
  0x1d   : > { %p2139_p10 = pnand %p1427_p7, %p454_p8  ;;  %s2424_s4 = sld [smem:[#allocation29_spill]] }
  0x1e   : > { %s1984_s20 = smov [#allocation5]   ;;  %s2425_s7 = sld [smem:[#allocation30_spill]] }
  0x1f   : > { %p1618_p11 = pneg %p2139_p10  ;;  %s483_s21 = sshll.u32 %s1984_s20, 4  ;;  %s484_s21 = int_to_ptr.vmem [resolvable:$true] %s483_s21 }
  0x20   : > { %s1985_s25 = smov [#allocation8]   ;;  %s1986_s20 = smov 16  }
  0x21   : > { %p2153_p12 = pnand %p1641_p9, %p1618_p11  ;;  %s509_s26 = sshll.u32 %s1985_s25, 4  ;;  %s510_s26 = int_to_ptr.vmem [resolvable:$true] %s509_s26 }
  0x22   : > { %s1988_s27 = smov [#allocation2]   ;;  %s493_s25 = sshll.u32 %s2384_s5, 4  ;;  %s494_s25 = int_to_ptr.hbm [resolvable:$true] %s493_s25 }
  0x23   : > { %s481_s19 = sshll.u32 %s2424_s4, 4  ;;  %s1987_s4 = smov 1   ;;  %s482_s19 = int_to_ptr.hbm [resolvable:$true] %s481_s19 }
  0x24   : > { %s507_s1 = sshll.u32 %s2425_s7, 4  ;;  %s469_s7 = sshll.u32 %s2382_s3, 4  ;;  %s508_s1 = int_to_ptr.hbm [resolvable:$true] %s507_s1  ;;  %s470_s7 = int_to_ptr.hbm [resolvable:$true] %s469_s7 }
  0x25   : > { %1624 = dma.hbm_to_vmem [thread:$0]  (!%p2153_p12), %s482_s19, 16, %s484_s21, [#allocation6]  }
  0x26   : > { %1630 = dma.hbm_to_vmem [thread:$0]  (!%p2153_p12), %s508_s1, 32, %s510_s26, [#allocation9], %s1986_s20, %s1986_s20, %s1987_s4  }
  0x27   : > { %s471_s30 = sshll.u32 %s1988_s27, 4  ;;  %s1989_s19 = smov [#allocation7]   ;;  %s472_s30 = int_to_ptr.vmem [resolvable:$true] %s471_s30 }
  0x28   : > { %1621 = dma.hbm_to_vmem [thread:$0]  (!%p2153_p12), %s470_s7, 16, %s472_s30, [#allocation3]  }
  0x29   : > { %s495_s21 = sshll.u32 %s1989_s19, 4  ;;  %s527_s1 = sshll.u32 %s2389_s10, 4  ;;  %s496_s21 = int_to_ptr.vmem [resolvable:$true] %s495_s21  ;;  %s528_s1 = int_to_ptr.hbm [resolvable:$true] %s527_s1 }
  0x2a   : > { %1627 = dma.hbm_to_vmem [thread:$0]  (!%p2153_p12), %s494_s25, 16, %s496_s21, [#allocation6]  }
  0x2b   : > { %s1990_s27 = smov [#allocation10]   ;;  %s544_s20 = sshll.u32 %s2391_s12, 4  ;;  %s545_s20 = int_to_ptr.hbm [resolvable:$true] %s544_s20 }
  0x2c   : > { %s529_s26 = sshll.u32 %s1990_s27, 4  ;;  %s1991_s7 = smov 64   ;;  %s530_s26 = int_to_ptr.vmem [resolvable:$true] %s529_s26 }
  0x2d   : > { %s1992_s30 = smov 4   ;;  %s1993_s29 = smov [#allocation11]  }
  0x2e   : > { %1633 = dma.hbm_to_vmem [thread:$0]  (!%p2153_p12), %s528_s1, 512, %s530_s26, [#allocation9], %s1991_s7, %s1991_s7, %s1992_s30  }
  0x2f   : > { %s546_s17 = sshll.u32 %s1993_s29, 4  ;;  %591 = sbr.rel (%p2139_p10) target bundleno = 1710 (0x6ae), region = 92  ;;  %s547_s17 = int_to_ptr.vmem [resolvable:$true] %s546_s17 }
  0x30   : > { %1636 = dma.hbm_to_vmem [thread:$0]  (!%p2153_p12), %s545_s20, 512, %s547_s17, [#allocation12], %s1991_s7, %s1991_s7, %s1992_s30  }
  0x34   : > { %1949 = dma.done.wait (%p1641_p9), [#allocation3], 16  }
  0x35   : > { %1951 = vsyncadd (%p1641_p9), [#allocation3], 4294967280 }
  0x36   : > { %1953 = dma.done.wait (%p1641_p9), [#allocation6], 32  }
  0x37   : > { %1955 = vsyncadd (%p1641_p9), [#allocation6], 4294967264 }
  0x38   : > { %1957 = dma.done.wait (%p1641_p9), [#allocation9], 544  }
  0x39   : > { %1959 = vsyncadd (%p1641_p9), [#allocation9], 4294966752 }
  0x3a   : > { %1961 = dma.done.wait (%p1641_p9), [#allocation12], 512  }
  0x3b   : > { %1963 = vsyncadd (%p1641_p9), [#allocation12], 4294966784  ;;  %p674_p13 = scmp.lt.s32.totalorder %s2111_s0, 1  ;;  %s2427_s19 = sld [smem:[#allocation26_spill]]  ;;  %vm687_vm0 = vcmask 261120   ;;  %v1994_v2 = vmov 32.0  }
  0x3c   : > { %1710 = vrcp.f32 %v1994_v2  ;;  %v1567_v14 = vld [vmem:[%s2385_s6 + $0x8] sm:$0xff]  ;;  %v1569_v15 = vld [vmem:[%s2385_s6 + $0x18] sm:$0xff]  ;;  %v1577_v17 = vld [vmem:[#allocation10 + $0x18] sm:$0xff]  ;;  %s2428_s26 = sld [smem:[#allocation27_spill]]  ;;  %vm1006_vm5 = vcmask 1043456   ;;  %vm976_vm6 = vcmask 64512  }
  0x3d   : > { %s2201_s23 = scalar_select %p674_p13, %s2111_s0, 1  ;;  %v1573_v16 = vld [vmem:[%s2387_s8 + $0x18] sm:$0xff]  ;;  %768 = vmatpush.bf16.msra.mxu0 %v1567_v14  ;;  %793 = vmatpush.bf16.msra.mxu2 %v1569_v15  ;;  %v1566_v18 = vld [vmem:[%s2385_s6] sm:$0xff]  ;;  %v1568_v19 = vld [vmem:[%s2385_s6 + $0x10] sm:$0xff] }
  0x3e   : > { %859 = vmatpush.bf16.msra.mxu3 %v1573_v16  ;;  %925 = vmatpush.bf16.msra.mxu1 %v1577_v17  ;;  %v1572_v20 = vld [vmem:[%s2387_s8 + $0x10] sm:$0xff]  ;;  %v1576_v21 = vld [vmem:[#allocation10 + $0x10] sm:$0xff]  ;;  %v1571_v25 = vld [vmem:[%s2387_s8 + $0x8] sm:$0xff]  ;;  %s2429_s7 = sld [smem:[#allocation28_spill]]  ;;  %s671_s20 = sand.u32 1, %s1974_s28  }
  0x3f   : > { %s1443_s24 = sshll.u32 %s2201_s23, 3  ;;  %v1575_v26 = vld [vmem:[#allocation10 + $0x8] sm:$0xff]  ;;  %v1570_v27 = vld [vmem:[%s2387_s8] sm:$0xff]  ;;  %v1574_v28 = vld [vmem:[#allocation10] sm:$0xff]  ;;  %s1563_s23 = sshll.u32 %s2111_s0, 3 }
  0x40   : > { %v1698_v39 = vld [vmem:[#allocation2] ss:$0 sm:$0xff]  ;;  %v1700_v48 = vld [vmem:[%s2390_s11 + $0x1] ss:$0 sm:$0xff]  ;;  %v1701_v60 = vld [vmem:[#allocation8 + $0x1] ss:$0 sm:$0xff] }
  0x41   : > { %s677_s21 = scalar_lea.vmem %s2427_s19, %s1443_s24  ;;  %769 = vmatpush.bf16.msra.mxu0 %v1566_v18  ;;  %794 = vmatpush.bf16.msra.mxu2 %v1568_v19  ;;  %v1702_v53 = vld [vmem:[%s2388_s9 + $0x1] ss:$0 sm:$0xff]  ;;  %v1703_v63 = vld [vmem:[%s2390_s11] ss:$0 sm:$0xff]  ;;  %v1699_v14 = vld [vmem:[#allocation8] ss:$0 sm:$0xff] }
  0x42   : > { %v2209_v0 = vld [vmem:[%s677_s21] sm:$0xff]  ;;  %v1711_v3 = vpop.eup %1710  ;;  %860 = vmatpush.bf16.msra.mxu3 %v1572_v20  ;;  %926 = vmatpush.bf16.msra.mxu1 %v1576_v21  ;;  %s681_s18 = scalar_lea.vmem %s2428_s26, %s1443_s24  ;;  %s2430_s29 = sld [smem:[#allocation31_spill]] }
  0x43   : > { %v688_v1 = vsel %vm687_vm0, %v2209_v0, 0.0  ;;  %v692_v4 = vmul.f32 32.0, %v1711_v3  ;;  %vm696_vm1 = vweird.f32 %v1711_v3  ;;  %v2248_v33 = vld [vmem:[%s681_s18] sm:$0x3f]  ;;  %s2431_s25 = sld [smem:[#allocation32_spill]]  ;;  %s1280_s0 = scalar_lea.sflag [#allocation4], %s671_s20 }
  0x44   : > { %689 = vadd.xlane.f32.xlu0 %v688_v1  ;;  %v2251_v36 = vadd.f32 1.0, %v2248_v33  ;;  %v1697_v37 = vld [vmem:[%s2429_s7] ss:$0 sm:$0xff]  ;;  %v728_v43 = vperm.slane %v2248_v33, 1  ;;  %s1442_s7 = sshll.u32 %s671_s20, 3 }
  0x45   : > { %v693_v5 = vsub.f32 1.0, %v692_v4  ;;  %834 = vmatpush.bf16.msrb.mxu2 %v1571_v25  ;;  %900 = vmatpush.bf16.msrb.mxu0 %v1575_v26  ;;  %s673_s4 = scalar_lea.vmem [#allocation13], %s1442_s7 }
  0x46   : > { %v726_v41 = vperm.slane %v2251_v36, 0  ;;  %s1292_s1 = sshll.u32 %s673_s4, 4  ;;  %s1293_s1 = int_to_ptr.vmem [resolvable:$true] %s1292_s1 }
  0x47   : > { %v694_v6 = vmul.f32 %v1711_v3, %v693_v5 }
  0x49   : > { %v695_v7 = vadd.f32 %v1711_v3, %v694_v6  ;;  %835 = vmatpush.bf16.msrb.mxu2 %v1570_v27  ;;  %901 = vmatpush.bf16.msrb.mxu0 %v1574_v28  ;;  %s1290_s19 = scalar_lea.hbm %s2431_s25, %s1563_s23  ;;  %s1924_s23 = scalar_lea.hbm %s2431_s25, 16 }
  0x4a   : > { %s1294_s27 = sshll.u32 %s1290_s19, 4  ;;  %s1295_s27 = int_to_ptr.hbm [resolvable:$true] %s1294_s27 }
  0x4b   : > { %v2213_v8 = vsel %vm696_vm1, %v1711_v3, %v695_v7  ;;  %s1918_s26 = sshra.s32 %s1295_s27, 4  ;;  %s1919_s26 = int_to_ptr.hbm [resolvable:$true] %s1918_s26 }
  0x4c   : > { %s1920_s18 = scalar_lea.hbm %s1919_s26, 8  ;;  %p1925_p3 = scmp.lt.s32.totalorder %s1919_s26, %s2431_s25 }
  0x4d   : > { %p1921_p0 = scmp.ne.s32.totalorder %s1919_s26, %s1920_s18  ;;  %p1926_p4 = scmp.lt.s32.totalorder %s1924_s23, %s1920_s18 }
  0x4f   : > { %p1922_p1 = pnand %p1921_p0, %p2128_p5  ;;  %p1927_p7 = por %p1926_p4, %p1925_p3 }
  0x51   : > { %p1923_p2 = pneg %p1922_p1 }
  0x53   : > { %p1928_p8 = pnand %p1927_p7, %p1923_p2 }
  0xb7   : > { %v690_v9 = vpop.xlane.xlu0 %689 }
  0xb8   : > { %v698_v10 = vmul.f32 %v2213_v8, %v690_v9  ;;  %v1704_v9 = vld [vmem:[%s2388_s9] ss:$0 sm:$0xff] }
  0xba   : > { %v699_v11 = vsub.f32 %v2209_v0, %v698_v10 }
  0xbc   : > { %v700_v12 = vmul.f32 %v699_v11, %v699_v11 }
  0xbe   : > { %v701_v13 = vsel %vm687_vm0, %v700_v12, 0.0 }
  0xbf   : > { %702 = vadd.xlane.f32.xlu0 %v701_v13 }
 0x132   : > { %v703_v22 = vpop.xlane.xlu0 %702 }
 0x133   : > { %v704_v23 = vmul.f32 %v703_v22, %v2213_v8 }
 0x135   : > { %v705_v24 = vadd.f32 1e-05, %v704_v23 }
 0x137   : > { %1712 = vrsqrt.f32 %v705_v24  ;;  %vm712_vm3 = vweird.f32 %v705_v24 }
 0x13d   : > { %v1713_v29 = vpop.eup %1712 }
 0x13e   : > { %v707_v30 = vmul.f32 %v1713_v29, %v705_v24  ;;  %vm713_vm2 = vweird.f32 %v1713_v29 }
 0x13f   : > { %vm714_vm4 = vmor %vm712_vm3, %vm713_vm2 }
 0x140   : > { %v708_v31 = vmul.f32 %v1713_v29, %v707_v30 }
 0x142   : > { %v709_v32 = vmul.f32 0.5, %v708_v31 }
 0x144   : > { %v710_v34 = vsub.f32 1.5, %v709_v32 }
 0x146   : > { %v711_v35 = vmul.f32 %v1713_v29, %v710_v34 }
 0x148   : > { %v715_v38 = vsel %vm714_vm4, %v1713_v29, %v711_v35 }
 0x149   : > { %v716_v40 = vmul.f32 %v715_v38, %v699_v11 }
 0x14b   : > { %v720_v42 = vmul.f32 %v1697_v37, %v716_v40  ;;  %v1579_v40 = vld [vmem:[#allocation11 + $0x8] sm:$0xff] }
 0x14d   : > { %v724_v44 = vadd.f32 %v1698_v39, %v720_v42 }
 0x14f   : > { %v727_v45 = vmul.f32 %v726_v41, %v724_v44 }
 0x151   : > { %v729_v46 = vadd.f32 %v728_v43, %v727_v45 }
 0x153   : > { %v730_v47 = vpack.c.bf16 %v729_v46, %v729_v46 }
 0x155   : > { %1453 = vmatmul.msk.bf16.vlgmr.msra.gmra.mxu0 %vm687_vm0, %v730_v47  ;;  %1462 = vmatmul.msk.bf16.vlgmr.msra.gmra.mxu2 %vm687_vm0, %v730_v47 }
 0x156   : > { %1480 = vmatmul.msk.bf16.vlgmr.msra.gmra.mxu3 %vm687_vm0, %v730_v47  ;;  %1498 = vmatmul.msk.bf16.vlgmr.msra.gmra.mxu1 %vm687_vm0, %v730_v47 }
 0x165   : > { %1471 = vmatmul.msk.bf16.vlgmr.msrb.gmra.mxu2 %vm687_vm0, %v730_v47  ;;  %1489 = vmatmul.msk.bf16.vlgmr.msrb.gmra.mxu0 %vm687_vm0, %v730_v47 }
 0x1d2   : > { %v771_v49 = vpop.f32.mrf.mxu0 }
 0x1d3   : > { %v928_v50 = vpop.f32.mrf.mxu1  ;;  %v772_v17 = vadd.f32 %v1699_v14, %v771_v49  ;;  %v1578_v49 = vld [vmem:[#allocation11] sm:$0xff] }
 0x1d4   : > { %v929_v51 = vadd.f32 %v1700_v48, %v928_v50  ;;  %v1581_v50 = vld [vmem:[#allocation11 + $0x18] sm:$0xff]  ;;  %v1583_v14 = vld [vmem:[%s2393_s14 + $0x8] sm:$0xff] }
 0x1d5   : > { %v932_v19 = vpack.c.bf16 %v772_v17, %v772_v17 }
 0x1d6   : > { %v1002_v52 = vpack.c.bf16 %v929_v51, %v929_v51  ;;  %v1580_v51 = vld [vmem:[#allocation11 + $0x10] sm:$0xff] }
 0x1d8   : > { %v796_v54 = vpop.f32.mrf.mxu2  ;;  %v1027_v55 = vsel %vm1006_vm5, %v1002_v52, 0 }
 0x1d9   : > { %v862_v56 = vpop.f32.mrf.mxu3  ;;  %1036 = vmatpush.bf16.msrb.mxu1 %v1027_v55  ;;  %v797_v1 = vadd.f32 %v1701_v60, %v796_v54 }
 0x1da   : > { %v863_v57 = vadd.f32 %v1702_v53, %v862_v56  ;;  %v773_v58 = vpop.f32.mrf.mxu0 }
 0x1db   : > { %v930_v59 = vpop.f32.mrf.mxu1  ;;  %v933_v6 = vpack.c.bf16 %v797_v1, %v797_v1 }
 0x1dc   : > { %v935_v61 = vpack.c.bf16 %v863_v57, %v863_v57 }
 0x1de   : > { %v959_v62 = vsel %vm687_vm0, %v935_v61, 0  ;;  %v1705_v61 = vld [vmem:[%s2392_s13] ss:$0 sm:$0xff] }
 0x1df   : > { %968 = vmatpush.bf16.xpose.msrb.mxu3 %v959_v62 }
 0x1e0   : > { %v798_v2 = vpop.f32.mrf.mxu2 }
 0x1e1   : > { %v864_v3 = vpop.f32.mrf.mxu3  ;;  %v1116_v2 = vperm.slane %v2248_v33, 2 }
 0x1e2   : > { %v903_v4 = vpop.f32.mrf.mxu0 }
 0x1e3   : > { %v904_v5 = vadd.f32 %v1703_v63, %v903_v4 }
 0x1e5   : > { %v1001_v7 = vpack.c.bf16 %v904_v5, %v904_v5 }
 0x1e6   : > { %1500 = vmatmul.msk.bf16.vlgmr.msrb.gmra.mxu3 %vm687_vm0, %v933_v6 }
 0x1e7   : > { %v1008_v10 = vsel %vm1006_vm5, %v1001_v7, 0  ;;  %1101 = vmatpush.bf16.msra.mxu3 %v1581_v50  ;;  %v1275_v50 = vperm.slane %v2248_v33, 5 }
 0x1e8   : > { %v837_v11 = vpop.f32.mrf.mxu2  ;;  %1017 = vmatpush.bf16.msra.mxu0 %v1008_v10 }
 0x1e9   : > { %v838_v12 = vadd.f32 %v1704_v9, %v837_v11 }
 0x1ea   : > { %v905_v13 = vpop.f32.mrf.mxu0 }
 0x1eb   : > { %v934_v15 = vpack.c.bf16 %v838_v12, %v838_v12  ;;  %1102 = vmatpush.bf16.msra.mxu3 %v1580_v51 }
 0x1ec   : > { %1185 = vmatpush.bf16.msrb.mxu0 %v1583_v14 }
 0x1ed   : > { %v940_v16 = vsel %vm687_vm0, %v934_v15, 0 }
 0x1ee   : > { %949 = vmatpush.bf16.xpose.msra.mxu2 %v940_v16 }
 0x1f0   : > { %v839_v18 = vpop.f32.mrf.mxu2 }
 0x1f1   : > { %v1591_v18 = vld [vmem:[%s2395_s16 + $0x38] sm:$0xff] }
 0x1f2   : > { %1262 = vmatpush.bf16.msra.mxu1 %v1591_v18 }
 0x1f5   : > { %1499 = vmatmul.msk.bf16.vlgmr.msra.gmra.mxu2 %vm687_vm0, %v932_v19  ;;  %v1590_v19 = vld [vmem:[%s2395_s16 + $0x30] sm:$0xff] }
 0x1f6   : > { %1073 = vmatpush.bf16.msrb.mxu2 %v1579_v40  ;;  %1263 = vmatpush.bf16.msra.mxu1 %v1590_v19 }
 0x1fa   : > { %1074 = vmatpush.bf16.msrb.mxu2 %v1578_v49  ;;  %v1709_v49 = vld [vmem:[%s2430_s29] ss:$0 sm:$0xff] }
 0x269   : > { %v970_v20 = vpop.f32.mrf.mxu3 }
 0x26a   : > { %v975_v25 = vmul.f32 0.35355338, %v970_v20  ;;  %v1589_v20 = vld [vmem:[%s2395_s16 + $0x28] sm:$0xff] }
 0x26b   : > { %1264 = vmatpush.bf16.msra.mxu1 %v1589_v20 }
 0x26c   : > { %v980_v27 = vsel %vm976_vm6, %v975_v25, -inf }
 0x271   : > { %v972_v21 = vpop.f32.mrf.mxu3 }
 0x278   : > { %v951_v22 = vpop.f32.mrf.mxu2 }
 0x279   : > { %v974_v23 = vmul.f32 0.35355338, %v951_v22 }
 0x27b   : > { %v977_v24 = vsel %vm976_vm6, %v974_v23, -inf }
 0x27c   : > { %978 = vmax.xlane.f32.xlu1 %v977_v24 }
 0x280   : > { %v953_v26 = vpop.f32.mrf.mxu2 }
 0x284   : > { %981 = vmax.xlane.f32.xlu1 %v980_v27 }
 0x2ef   : > { %v979_v28 = vpop.xlane.xlu1 %978 }
 0x2f0   : > { %v983_v29 = vsub.f32 %v974_v23, %v979_v28  ;;  %v1706_v28 = vld [vmem:[#allocation5] ss:$0 sm:$0xff] }
 0x2f2   : > { %v985_v30 = vmul.f32 1.442695, %v983_v29  ;;  %v1586_v29 = vld [vmem:[%s2395_s16 + $0x10] sm:$0xff] }
 0x2f4   : > { %1714 = vpow2.f32 %v985_v30 }
 0x2f7   : > { %v982_v31 = vpop.xlane.xlu1 %981 }
 0x2f8   : > { %v984_v32 = vsub.f32 %v975_v25, %v982_v31  ;;  %v1587_v25 = vld [vmem:[%s2395_s16 + $0x18] sm:$0xff]  ;;  %v1707_v31 = vld [vmem:[#allocation7] ss:$0 sm:$0xff] }
 0x2fa   : > { %v1715_v34 = vpop.eup %1714  ;;  %v987_v35 = vmul.f32 1.442695, %v984_v32 }
 0x2fb   : > { %v989_v37 = vsel %vm976_vm6, %v1715_v34, 0.0 }
 0x2fc   : > { %1716 = vpow2.f32 %v987_v35  ;;  %990 = vadd.xlane.f32.xlu2 %v989_v37  ;;  %v1153_v37 = vperm.slane %v2248_v33, 4 }
 0x302   : > { %v1717_v38 = vpop.eup %1716 }
 0x303   : > { %v992_v39 = vsel %vm976_vm6, %v1717_v38, 0.0 }
 0x304   : > { %993 = vadd.xlane.f32.xlu2 %v992_v39 }
 0x36f   : > { %v991_v41 = vpop.xlane.xlu2 %990 }
 0x370   : > { %1718 = vrcp.f32 %v991_v41 }
 0x376   : > { %v1719_v42 = vpop.eup %1718 }
 0x377   : > { %v997_v43 = vmul.f32 %v1719_v42, %v1715_v34  ;;  %v994_v44 = vpop.xlane.xlu2 %993  ;;  %v1151_v34 = vperm.slane %v2251_v36, 3  ;;  %v1585_v42 = vld [vmem:[%s2395_s16 + $0x8] sm:$0xff]  ;;  %v1584_v36 = vld [vmem:[%s2395_s16] sm:$0xff] }
 0x378   : > { %1720 = vrcp.f32 %v994_v44 }
 0x379   : > { %v999_v45 = vpack.c.bf16 %v997_v43, %v997_v43  ;;  %v1708_v43 = vld [vmem:[%s2394_s15] ss:$0 sm:$0xff] }
 0x37b   : > { %1501 = vmatmul.msk.bf16.vlgmr.msra.gmra.mxu0 %vm976_vm6, %v999_v45 }
 0x37e   : > { %v1721_v46 = vpop.eup %1720 }
 0x37f   : > { %v998_v47 = vmul.f32 %v1721_v46, %v1717_v38 }
 0x381   : > { %v1000_v48 = vpack.c.bf16 %v998_v47, %v998_v47 }
 0x383   : > { %1502 = vmatmul.msk.bf16.vlgmr.msrb.gmra.mxu1 %vm976_vm6, %v1000_v48 }
 0x3f8   : > { %v1019_v52 = vpop.f32.mrf.mxu0 }
 0x3f9   : > { %v1042_v53 = vpack.c.bf16 %v1019_v52, %v1019_v52 }
 0x3fb   : > { %1511 = vmatmul.msk.bf16.vlgmr.msrb.gmra.mxu2 %vm687_vm0, %v1042_v53 }
 0x400   : > { %v1021_v54 = vpop.f32.mrf.mxu0  ;;  %v1038_v55 = vpop.f32.mrf.mxu1 }
 0x401   : > { %v1043_v56 = vpack.c.bf16 %v1038_v55, %v1038_v55 }
 0x403   : > { %1520 = vmatmul.msk.bf16.vlgmr.msra.gmra.mxu3 %vm687_vm0, %v1043_v56 }
 0x408   : > { %v1040_v57 = vpop.f32.mrf.mxu1 }
 0x47e   : > { %v1076_v58 = vpop.f32.mrf.mxu2 }
 0x47f   : > { %v1108_v62 = vsel %vm687_vm0, %v1076_v58, 0.0 }
 0x486   : > { %v1078_v59 = vpop.f32.mrf.mxu2  ;;  %v1104_v60 = vpop.f32.mrf.mxu3 }
 0x487   : > { %v1109_v63 = vsel %vm687_vm0, %v1104_v60, 0.0 }
 0x488   : > { %v1110_v1 = vadd.f32 %v1109_v63, %v1108_v62 }
 0x48a   : > { %v1115_v3 = vadd.f32 %v1705_v61, %v1110_v1 }
 0x48c   : > { %v1117_v4 = vmul.f32 %v1116_v2, %v1115_v3 }
 0x48e   : > { %v1106_v5 = vpop.f32.mrf.mxu3  ;;  %v2297_v6 = vadd.f32 %v1117_v4, %v2209_v0  ;;  %v1582_v0 = vld [vmem:[%s2393_s14] sm:$0xff] }
 0x48f   : > { %1186 = vmatpush.bf16.msrb.mxu0 %v1582_v0 }
 0x490   : > { %v1121_v7 = vsel %vm687_vm0, %v2297_v6, 0.0 }
 0x491   : > { %1122 = vadd.xlane.f32.xlu0 %v1121_v7 }
 0x504   : > { %v1123_v9 = vpop.xlane.xlu0 %1122 }
 0x505   : > { %v1124_v10 = vmul.f32 %v1123_v9, %v2213_v8 }
 0x507   : > { %v1125_v11 = vsub.f32 %v2297_v6, %v1124_v10 }
 0x509   : > { %v1126_v12 = vmul.f32 %v1125_v11, %v1125_v11 }
 0x50b   : > { %v1127_v13 = vsel %vm687_vm0, %v1126_v12, 0.0 }
 0x50c   : > { %1128 = vadd.xlane.f32.xlu1 %v1127_v13 }
 0x57f   : > { %v1129_v15 = vpop.xlane.xlu1 %1128 }
 0x580   : > { %v1130_v16 = vmul.f32 %v1129_v15, %v2213_v8  ;;  %v1588_v8 = vld [vmem:[%s2395_s16 + $0x20] sm:$0xff] }
 0x581   : > { %1265 = vmatpush.bf16.msra.mxu1 %v1588_v8 }
 0x582   : > { %v1131_v17 = vadd.f32 1e-05, %v1130_v16 }
 0x584   : > { %1722 = vrsqrt.f32 %v1131_v17  ;;  %vm1138_vm8 = vweird.f32 %v1131_v17 }
 0x585   : > { %1266 = vmatpush.bf16.msra.mxu1 %v1587_v25 }
 0x589   : > { %1267 = vmatpush.bf16.msra.mxu1 %v1586_v29 }
 0x58a   : > { %v1723_v21 = vpop.eup %1722 }
 0x58b   : > { %v1133_v22 = vmul.f32 %v1723_v21, %v1131_v17  ;;  %vm1139_vm7 = vweird.f32 %v1723_v21 }
 0x58c   : > { %vm1140_vm9 = vmor %vm1138_vm8, %vm1139_vm7 }
 0x58d   : > { %v1134_v23 = vmul.f32 %v1723_v21, %v1133_v22  ;;  %1268 = vmatpush.bf16.msra.mxu1 %v1585_v42 }
 0x58f   : > { %v1135_v24 = vmul.f32 0.5, %v1134_v23 }
 0x591   : > { %v1136_v26 = vsub.f32 1.5, %v1135_v24  ;;  %1269 = vmatpush.bf16.msra.mxu1 %v1584_v36 }
 0x593   : > { %v1137_v27 = vmul.f32 %v1723_v21, %v1136_v26 }
 0x595   : > { %v1141_v30 = vsel %vm1140_vm9, %v1723_v21, %v1137_v27 }
 0x596   : > { %v1142_v32 = vmul.f32 %v1141_v30, %v1125_v11 }
 0x598   : > { %v1146_v35 = vmul.f32 %v1706_v28, %v1142_v32 }
 0x59a   : > { %v1150_v38 = vadd.f32 %v1707_v31, %v1146_v35 }
 0x59c   : > { %v1152_v39 = vmul.f32 %v1151_v34, %v1150_v38 }
 0x59e   : > { %v1154_v40 = vadd.f32 %v1153_v37, %v1152_v39 }
 0x5a0   : > { %v1155_v41 = vpack.c.bf16 %v1154_v40, %v1154_v40 }
 0x5a2   : > { %1529 = vmatmul.msk.bf16.vlgmr.msrb.gmra.mxu0 %vm687_vm0, %v1155_v41 }
 0x61f   : > { %v1188_v44 = vpop.f32.mrf.mxu0 }
 0x620   : > { %v1189_v45 = vadd.f32 %v1708_v43, %v1188_v44 }
 0x622   : > { %v1192_v46 = vmax.f32 %v1189_v45, 0.0 }
 0x624   : > { %v1193_v47 = vpack.c.bf16 %v1192_v46, %v1192_v46 }
 0x626   : > { %1270 = vmatmul.bf16.vlgmr.msra.gmra.mxu1 %v1193_v47 }
 0x627   : > { %v1190_v48 = vpop.f32.mrf.mxu0 }
 0x6a3   : > { %v1271_v51 = vpop.f32.mrf.mxu1 }
 0x6a4   : > { %v1272_v52 = vadd.f32 %v1709_v49, %v1271_v51 }
 0x6a6   : > { %v1276_v53 = vmul.f32 %v1275_v50, %v1272_v52 }
 0x6a8   : > { %v1277_v54 = vadd.f32 %v1276_v53, %v2297_v6 }
 0x6aa   : > { %1278 = vst.msk [vmem:[%s673_s4] sm:$0xff] %vm687_vm0, %v1277_v54 }
 0x6ab   : > { %v1273_v55 = vpop.f32.mrf.mxu1 }
 0x6ac   : > { %1931 = shalt.err (!%p1928_p8)
}
 0x6ad   : > { %1616 = dma.vmem_to_hbm [thread:$0]  (%p2128_p5), %s1293_s1, 128, %s1295_s27, %s1280_s0  }
 0x6ae PF: > { %s2433_s20 = sld [smem:[#allocation21_spill]] }
 0x6af   : > { %s2434_s29 = sld [smem:[#allocation19_spill]] }
 0x6b4   : > { %p1653_p9 = scmp.ge.s32.totalorder %s2433_s20, 2 }
 0x6b5   : > { %s1306_s22 = sand.u32 1, %s2434_s29  }
 0x6b6   : > { %p1638_p10 = pnand %p1653_p9, %p2132_p6  ;;  %s1307_s19 = scalar_lea.sflag [#allocation4], %s1306_s22 }
 0x6b8   : > { %p1639_p11 = pneg %p1638_p10 }
 0x6ba   : > { %1965 = dma.done.wait (%p1639_p11), %s1307_s19, 128  }
 0x6bb   : > { %1967 = vsyncadd (%p1639_p11), %s1307_s19, 4294967168  ;;  %s2436_s30 = sld [smem:[#allocation22_spill]]  ;;  %s2439_s27 = smov %s1974_s28 }
 0x6bc   : > { %s2437_s4 = sld [smem:[#allocation20_spill]] }
 0x6bd   : > { %s2438_s29 = sld [smem:[#allocation23_spill]] }
 0x6c1   : > { %p32_p12 = scmp.ge.s32.totalorder %s2436_s30, 4  }
 0x6c2   : > { %s2440_s28 = smov %s2437_s4 }
 0x6c3   :  { %34 = sbr.rel (!%p32_p12) target bundleno = 15 (0xf), region = 155 }
 0x6c8   :  { %1313 = vsyncpa [#allocation3], 1 }
 0x6c9   :  { %1315 = vsyncpa [#allocation3 + $0x1], 1 }
 0x6ca   :  { %1316 = vsyncpa [#allocation6], 1 }
 0x6cb   :  { %1317 = vsyncpa [#allocation9], 1 }
 0x6cc   :  { %1318 = vsyncpa [#allocation12], 1 }
 0x6cd   :  { %1319 = vsyncpa [#allocation4], 1 }
 0x6ce   :  { %1321 = vsyncpa [#allocation4 + $0x1], 1 }

</bundles_post_ra>
